<compile_context>
chip_gen: v6e
topology: v6e:2x2x1
jax: 0.10.0
libtpu: 0.0.40
codegen_flags: <defaults>
</compile_context>

<pallas_src>
import numpy as np
from typing import NamedTuple

import jax
import jax.numpy as jnp
from jax import lax
from jax.experimental import pallas as pl
from jax.experimental.pallas import tpu as pltpu

_EPS = 1e-12
_LANES = 128
_MAX_TILE_ROWS = 256          # 256 rows x 128 lanes = 32768 rays per tile per channel


class Cameras(NamedTuple):
    focal: jnp.ndarray       # (B, 2)  [fx, fy]
    principal: jnp.ndarray   # (B, 2)  [px, py]
    R: jnp.ndarray           # (B, 3, 3)  row-vector convention: X_cam = X_world @ R + T
    T: jnp.ndarray           # (B, 3)


class RayBundle(NamedTuple):
    xys: jnp.ndarray          # (B, ..., 2)  image-plane coords (origins_image)
    origins: jnp.ndarray      # (B, ..., 3)  world-space ray origins
    directions: jnp.ndarray   # (B, ..., 3)  unit-normalized world-space directions
    lengths: jnp.ndarray      # (B, ..., S)  sampled depths along each ray


def _row_tiling(n_rays):
    """Pack the flattened ray axis into fully occupied (rows, 128) slabs + pick a tile."""
    rows = -(-n_rays // _LANES)
    rows8 = max(8, -(-rows // 8) * 8)                 # sublane-full
    if rows8 <= _MAX_TILE_ROWS:
        tile_rows = rows8
        rows_padded = rows8
    else:
        tile_rows = _MAX_TILE_ROWS
        rows_padded = -(-rows8 // tile_rows) * tile_rows
    return rows_padded, tile_rows


def _xy_to_channels_first(xy_flat, rows_padded):
    """(B, N, 2) -> (B, 2, rows_padded, 128) lane/sublane-dense slabs."""
    B, N, _ = xy_flat.shape
    xy_cf = jnp.transpose(xy_flat, (0, 2, 1)).astype(jnp.float32)        # (B, 2, N)
    xy_cf = jnp.pad(xy_cf, ((0, 0), (0, 0), (0, rows_padded * _LANES - N)))
    return xy_cf.reshape(B, 2, rows_padded, _LANES)


# cam_ref (SMEM, (B, 13)) layout: [1/fx, 1/fy, px, py, R00..R22]
# xy_ref  block: (1, 2, TILE_ROWS, 128) -> rows [x, y]
# dir_ref block: (1, 3, TILE_ROWS, 128) -> rows [dx, dy, dz], unit-normalized.
def _dir_kernel(cam_ref, xy_ref, dir_ref):
    b = pl.program_id(0)
    inv_fx = cam_ref[b, 0]
    inv_fy = cam_ref[b, 1]
    px = cam_ref[b, 2]
    py = cam_ref[b, 3]

    x = xy_ref[0, 0]                       # (TILE_ROWS, 128) fully packed slab
    y = xy_ref[0, 1]
    cx = (x - px) * inv_fx                 # camera coords at z = 1 (reciprocal-multiply)
    cy = (y - py) * inv_fy

    # directions = R @ (cx, cy, 1); origins are the per-camera constant -R@T (wrapper).
    d = []
    for k in range(3):
        r0 = cam_ref[b, 4 + 3 * k + 0]
        r1 = cam_ref[b, 4 + 3 * k + 1]
        r2 = cam_ref[b, 4 + 3 * k + 2]
        d.append(r0 * cx + r1 * cy + r2)

    # F.normalize(dim=-1, eps=1e-12): 1/max(|d|, eps) == rsqrt(max(d.d, eps^2)) (EUP slot).
    inv_norm = lax.rsqrt(jnp.maximum(d[0] * d[0] + d[1] * d[1] + d[2] * d[2], _EPS * _EPS))

    dir_ref[0, 0] = d[0] * inv_norm        # per-channel slab stores (no concatenate)
    dir_ref[0, 1] = d[1] * inv_norm
    dir_ref[0, 2] = d[2] * inv_norm


def _ray_directions_pallas(cam_params, xy_cf, tile_rows):
    """cam_params: (B, 13) f32; xy_cf: (Bxy, 2, rows, 128) with Bxy in {1, B}.
    Returns unit directions, channels-first: (B, 3, rows, 128)."""
    B = cam_params.shape[0]
    b_xy, _, rows, _ = xy_cf.shape
    n_row_tiles = rows // tile_rows

    if b_xy == 1:
        xy_index = lambda b, r: (0, 0, r, 0)     # shared grid: never duplicate per batch
    else:
        xy_index = lambda b, r: (b, 0, r, 0)

    return pl.pallas_call(
        _dir_kernel,
        out_shape=jax.ShapeDtypeStruct((B, 3, rows, _LANES), jnp.float32),
        grid=(B, n_row_tiles),
        in_specs=[
            pl.BlockSpec(memory_space=pltpu.MemorySpace.SMEM),            # camera scalars
            pl.BlockSpec((1, 2, tile_rows, _LANES), xy_index),
        ],
        out_specs=pl.BlockSpec((1, 3, tile_rows, _LANES), lambda b, r: (b, 0, r, 0)),
        compiler_params=pltpu.CompilerParams(
            dimension_semantics=("parallel", "parallel")),
    )(cam_params, xy_cf)


class LanternRaySampler:
    """JAX/Pallas port of lantern.models.raysampling.LanternRaySampler."""

    def __init__(self, image_width, image_height, min_depth, max_depth,
                 num_rays_per_image, num_samples_per_ray):
        self._min_depth = float(min_depth)
        self._max_depth = float(max_depth)
        self._num_rays_per_image = int(num_rays_per_image)
        self._num_samples_per_ray = int(num_samples_per_ray)

        # NDCGridRaysampler grid: (image_height+1, image_width+1, 2) with [x, y] last dim.
        half_pix_w = 1.0 / image_width
        half_pix_h = 1.0 / image_height
        min_x, max_x = 1.0 - half_pix_w, -1.0 + half_pix_w
        min_y, max_y = 1.0 - half_pix_h, -1.0 + half_pix_h
        ys = jnp.linspace(min_y, max_y, image_height + 1, dtype=jnp.float32)
        xs = jnp.linspace(min_x, max_x, image_width + 1, dtype=jnp.float32)
        Y, X = jnp.meshgrid(ys, xs, indexing="ij")
        self._xy_grid = jnp.stack([X, Y], axis=-1)                  # (H+1, W+1, 2)

        # Precompute the channels-first, lane/sublane-dense version once (no runtime
        # transpose/pad for the eval path; batch dim stays 1 and is never duplicated).
        n_grid = (image_height + 1) * (image_width + 1)
        self._grid_rows, self._grid_tile_rows = _row_tiling(n_grid)
        self._xy_grid_cf = _xy_to_channels_first(
            self._xy_grid.reshape(1, n_grid, 2), self._grid_rows)   # (1, 2, rows, 128)

    @staticmethod
    def _cam_params(cameras):
        """Pack [1/fx, 1/fy, px, py, R00..R22] -> (B, 13); reciprocals hoisted to host."""
        B = cameras.R.shape[0]
        inv_focal = 1.0 / cameras.focal.astype(jnp.float32)
        return jnp.concatenate(
            [inv_focal, cameras.principal.astype(jnp.float32),
             cameras.R.reshape(B, 9).astype(jnp.float32)], axis=-1)

    def _xy_to_ray_bundle(self, cameras, xy_grid, xy_cf, tile_rows):
        B = xy_grid.shape[0]
        spatial = tuple(xy_grid.shape[1:-1])
        N = int(np.prod(spatial))

        cam_params = self._cam_params(cameras)
        dirs_cf = _ray_directions_pallas(cam_params, xy_cf, tile_rows)  # (B, 3, rows, 128)

        # Back to the PyTorch (B, ..., 3) layout (single XLA transpose; kernel output
        # stays lane-dense so stores are unmasked full-width vst).
        directions = jnp.transpose(
            dirs_cf.reshape(B, 3, -1)[:, :, :N], (0, 2, 1)).reshape((B,) + spatial + (3,))

        # origins = w1 - (w2 - w1) telescopes exactly to -R @ T: per-camera constant,
        # broadcast only (no per-ray compute, no kernel writes).
        origins_cam = -jnp.einsum("bij,bj->bi", cameras.R.astype(jnp.float32),
                                  cameras.T.astype(jnp.float32))
        origins = jnp.broadcast_to(
            origins_cam.reshape((B,) + (1,) * len(spatial) + (3,)),
            (B,) + spatial + (3,))

        # lengths is pure broadcast data; materialized only because the module returns it.
        depths = jnp.linspace(self._min_depth, self._max_depth,
                              self._num_samples_per_ray, dtype=xy_grid.dtype)
        lengths = jnp.broadcast_to(
            depths, (B,) + spatial + (self._num_samples_per_ray,))

        return RayBundle(xys=xy_grid, origins=origins,
                         directions=directions, lengths=lengths)

    def __call__(self, cameras, *, training=False, rng=None):
        B = cameras.R.shape[0]
        if training:
            assert rng is not None
            # MonteCarloRaySampler with min/max x,y = (-1, 1)
            xy = jax.random.uniform(rng, (B, self._num_rays_per_image, 2),
                                    dtype=jnp.float32, minval=-1.0, maxval=1.0)
            rows_padded, tile_rows = _row_tiling(self._num_rays_per_image)
            xy_cf = _xy_to_channels_first(xy, rows_padded)
            return self._xy_to_ray_bundle(cameras, xy, xy_cf, tile_rows)
        else:
            xy = jnp.broadcast_to(self._xy_grid[None], (B,) + self._xy_grid.shape)
            return self._xy_to_ray_bundle(cameras, xy, self._xy_grid_cf,
                                          self._grid_tile_rows)


def _reference(cameras, xy_flat):
    """Plain-JAX reference using the original (non-telescoped) two-plane formulation."""
    fx = cameras.focal[:, 0][:, None]
    fy = cameras.focal[:, 1][:, None]
    px = cameras.principal[:, 0][:, None]
    py = cameras.principal[:, 1][:, None]
    R, T = cameras.R, cameras.T
    x = xy_flat[..., 0]
    y = xy_flat[..., 1]
    cx = (x - px) / fx
    cy = (y - py) / fy
    ones = jnp.ones_like(cx)
    cam1 = jnp.stack([cx, cy, ones], axis=-1)
    cam2 = jnp.stack([2.0 * cx, 2.0 * cy, 2.0 * ones], axis=-1)
    w1 = jnp.einsum("bkj,bnj->bnk", R, cam1 - T[:, None, :])
    w2 = jnp.einsum("bkj,bnj->bnk", R, cam2 - T[:, None, :])
    dirs = w2 - w1
    origins = w1 - dirs
    nrm = jnp.maximum(jnp.linalg.norm(dirs, axis=-1, keepdims=True), _EPS)
    return origins, dirs / nrm


if __name__ == "__main__":
    key = jax.random.PRNGKey(0)
    B = 2
    image_w = image_h = 16
    S = 8
    n_rays_mc = 64

    k_ang, k_t, k_rng = jax.random.split(key, 3)
    angles = jax.random.uniform(k_ang, (B, 2), minval=-0.5, maxval=0.5)

    def rot_mat(a, b):
        ca, sa = jnp.cos(a), jnp.sin(a)
        cb, sb = jnp.cos(b), jnp.sin(b)
        Rz = jnp.array([[ca, -sa, 0.0], [sa, ca, 0.0], [0.0, 0.0, 1.0]])
        Ry = jnp.array([[cb, 0.0, sb], [0.0, 1.0, 0.0], [-sb, 0.0, cb]])
        return Rz @ Ry

    R = jax.vmap(rot_mat)(angles[:, 0], angles[:, 1]).astype(jnp.float32)
    T = jax.random.uniform(k_t, (B, 3), minval=-0.2, maxval=0.2).astype(jnp.float32)
    focal = jnp.array([[1.2, 1.5], [1.1, 1.3]], dtype=jnp.float32)
    principal = jnp.array([[0.05, -0.03], [-0.02, 0.04]], dtype=jnp.float32)
    cameras = Cameras(focal=focal, principal=principal, R=R, T=T)

    sampler = LanternRaySampler(image_width=image_w, image_height=image_h,
                                min_depth=0.5, max_depth=4.0,
                                num_rays_per_image=n_rays_mc,
                                num_samples_per_ray=S)

    # eval path (NDCGridRaysampler) and train path (MonteCarloRaySampler)
    bundle_eval = sampler(cameras, training=False)
    jax.block_until_ready(bundle_eval)
    bundle_train = sampler(cameras, training=True, rng=k_rng)
    jax.block_until_ready(bundle_train)

    assert bundle_eval.origins.shape == (B, image_h + 1, image_w + 1, 3)
    assert bundle_eval.directions.shape == (B, image_h + 1, image_w + 1, 3)
    assert bundle_eval.lengths.shape == (B, image_h + 1, image_w + 1, S)
    assert bundle_eval.xys.shape == (B, image_h + 1, image_w + 1, 2)
    assert bundle_train.origins.shape == (B, n_rays_mc, 3)
    assert bundle_train.directions.shape == (B, n_rays_mc, 3)
    assert bundle_train.lengths.shape == (B, n_rays_mc, S)
    assert bundle_train.xys.shape == (B, n_rays_mc, 2)

    # cross-check the Pallas kernel against the plain-JAX reference (eval path)
    xy_flat = bundle_eval.xys.reshape(B, -1, 2)
    ref_o, ref_d = _reference(cameras, xy_flat)
    np.testing.assert_allclose(np.asarray(bundle_eval.origins.reshape(B, -1, 3)),
                               np.asarray(ref_o), rtol=1e-4, atol=1e-5)
    np.testing.assert_allclose(np.asarray(bundle_eval.directions.reshape(B, -1, 3)),
                               np.asarray(ref_d), rtol=1e-4, atol=1e-5)

    # cross-check the train (Monte Carlo) path as well
    ref_o_t, ref_d_t = _reference(cameras, bundle_train.xys)
    np.testing.assert_allclose(np.asarray(bundle_train.origins),
                               np.asarray(ref_o_t), rtol=1e-4, atol=1e-5)
    np.testing.assert_allclose(np.asarray(bundle_train.directions),
                               np.asarray(ref_d_t), rtol=1e-4, atol=1e-5)

    norms = jnp.linalg.norm(bundle_train.directions, axis=-1)
    np.testing.assert_allclose(np.asarray(norms), 1.0, rtol=1e-5, atol=1e-5)

    print("KERNEL_OK")
</pallas_src>

<mosaic_0001>
module attributes {stable_mosaic.version = 11 : i64} {
  func.func @_dir_kernel(%arg0: i32, %arg1: i32, %arg2: memref<2x13xf32, #tpu.memory_space<smem>>, %arg3: memref<1x2x8x128xf32, #tpu.memory_space<vmem>>, %arg4: memref<1x3x8x128xf32, #tpu.memory_space<vmem>>) attributes {dimension_semantics = [#tpu.dimension_semantics<parallel>, #tpu.dimension_semantics<parallel>], iteration_bounds = array<i64: 2, 1>, scalar_prefetch = 0 : i64, scratch_operands = 0 : i64, tpu.core_type = #tpu.core_type<tc>, window_params = [{transform_indices = @transform_0, window_bounds = array<i64: 2, 13>}, {transform_indices = @transform_1, window_bounds = array<i64: 1, 2, 8, 128>}, {transform_indices = @transform_2, window_bounds = array<i64: 1, 3, 8, 128>}]} {
    %0 = arith.index_cast %arg0 : i32 to index
    %c0 = arith.constant 0 : index
    %1 = memref.load %arg2[%0, %c0] : memref<2x13xf32, #tpu.memory_space<smem>>
    %2 = arith.index_cast %arg0 : i32 to index
    %c1 = arith.constant 1 : index
    %3 = memref.load %arg2[%2, %c1] : memref<2x13xf32, #tpu.memory_space<smem>>
    %4 = arith.index_cast %arg0 : i32 to index
    %c2 = arith.constant 2 : index
    %5 = memref.load %arg2[%4, %c2] : memref<2x13xf32, #tpu.memory_space<smem>>
    %6 = arith.index_cast %arg0 : i32 to index
    %c3 = arith.constant 3 : index
    %7 = memref.load %arg2[%6, %c3] : memref<2x13xf32, #tpu.memory_space<smem>>
    %c0_0 = arith.constant 0 : index
    %c0_1 = arith.constant 0 : index
    %c0_2 = arith.constant 0 : index
    %c0_3 = arith.constant 0 : index
    %8 = vector.load %arg3[%c0_0, %c0_1, %c0_2, %c0_3] : memref<1x2x8x128xf32, #tpu.memory_space<vmem>>, vector<1x1x8x128xf32>
    %9 = vector.shape_cast %8 : vector<1x1x8x128xf32> to vector<8x128xf32>
    %c0_4 = arith.constant 0 : index
    %c1_5 = arith.constant 1 : index
    %c0_6 = arith.constant 0 : index
    %c0_7 = arith.constant 0 : index
    %10 = vector.load %arg3[%c0_4, %c1_5, %c0_6, %c0_7] : memref<1x2x8x128xf32, #tpu.memory_space<vmem>>, vector<1x1x8x128xf32>
    %11 = vector.shape_cast %10 : vector<1x1x8x128xf32> to vector<8x128xf32>
    %12 = vector.broadcast %5 : f32 to vector<8x128xf32>
    %13 = arith.subf %9, %12 : vector<8x128xf32>
    %14 = vector.broadcast %1 : f32 to vector<8x128xf32>
    %15 = arith.mulf %13, %14 : vector<8x128xf32>
    %16 = vector.broadcast %7 : f32 to vector<8x128xf32>
    %17 = arith.subf %11, %16 : vector<8x128xf32>
    %18 = vector.broadcast %3 : f32 to vector<8x128xf32>
    %19 = arith.mulf %17, %18 : vector<8x128xf32>
    %20 = arith.index_cast %arg0 : i32 to index
    %c4 = arith.constant 4 : index
    %21 = memref.load %arg2[%20, %c4] : memref<2x13xf32, #tpu.memory_space<smem>>
    %22 = arith.index_cast %arg0 : i32 to index
    %c5 = arith.constant 5 : index
    %23 = memref.load %arg2[%22, %c5] : memref<2x13xf32, #tpu.memory_space<smem>>
    %24 = arith.index_cast %arg0 : i32 to index
    %c6 = arith.constant 6 : index
    %25 = memref.load %arg2[%24, %c6] : memref<2x13xf32, #tpu.memory_space<smem>>
    %26 = vector.broadcast %21 : f32 to vector<8x128xf32>
    %27 = arith.mulf %26, %15 : vector<8x128xf32>
    %28 = vector.broadcast %23 : f32 to vector<8x128xf32>
    %29 = arith.mulf %28, %19 : vector<8x128xf32>
    %30 = arith.addf %27, %29 : vector<8x128xf32>
    %31 = vector.broadcast %25 : f32 to vector<8x128xf32>
    %32 = arith.addf %30, %31 : vector<8x128xf32>
    %33 = arith.index_cast %arg0 : i32 to index
    %c7 = arith.constant 7 : index
    %34 = memref.load %arg2[%33, %c7] : memref<2x13xf32, #tpu.memory_space<smem>>
    %35 = arith.index_cast %arg0 : i32 to index
    %c8 = arith.constant 8 : index
    %36 = memref.load %arg2[%35, %c8] : memref<2x13xf32, #tpu.memory_space<smem>>
    %37 = arith.index_cast %arg0 : i32 to index
    %c9 = arith.constant 9 : index
    %38 = memref.load %arg2[%37, %c9] : memref<2x13xf32, #tpu.memory_space<smem>>
    %39 = vector.broadcast %34 : f32 to vector<8x128xf32>
    %40 = arith.mulf %39, %15 : vector<8x128xf32>
    %41 = vector.broadcast %36 : f32 to vector<8x128xf32>
    %42 = arith.mulf %41, %19 : vector<8x128xf32>
    %43 = arith.addf %40, %42 : vector<8x128xf32>
    %44 = vector.broadcast %38 : f32 to vector<8x128xf32>
    %45 = arith.addf %43, %44 : vector<8x128xf32>
    %46 = arith.index_cast %arg0 : i32 to index
    %c10 = arith.constant 10 : index
    %47 = memref.load %arg2[%46, %c10] : memref<2x13xf32, #tpu.memory_space<smem>>
    %48 = arith.index_cast %arg0 : i32 to index
    %c11 = arith.constant 11 : index
    %49 = memref.load %arg2[%48, %c11] : memref<2x13xf32, #tpu.memory_space<smem>>
    %50 = arith.index_cast %arg0 : i32 to index
    %c12 = arith.constant 12 : index
    %51 = memref.load %arg2[%50, %c12] : memref<2x13xf32, #tpu.memory_space<smem>>
    %52 = vector.broadcast %47 : f32 to vector<8x128xf32>
    %53 = arith.mulf %52, %15 : vector<8x128xf32>
    %54 = vector.broadcast %49 : f32 to vector<8x128xf32>
    %55 = arith.mulf %54, %19 : vector<8x128xf32>
    %56 = arith.addf %53, %55 : vector<8x128xf32>
    %57 = vector.broadcast %51 : f32 to vector<8x128xf32>
    %58 = arith.addf %56, %57 : vector<8x128xf32>
    %59 = arith.mulf %32, %32 : vector<8x128xf32>
    %60 = arith.mulf %45, %45 : vector<8x128xf32>
    %61 = arith.addf %59, %60 : vector<8x128xf32>
    %62 = arith.mulf %58, %58 : vector<8x128xf32>
    %63 = arith.addf %61, %62 : vector<8x128xf32>
    %cst = arith.constant 1.000000e-24 : f32
    %64 = vector.broadcast %cst : f32 to vector<8x128xf32>
    %65 = arith.maximumf %63, %64 : vector<8x128xf32>
    %66 = math.rsqrt %65 : vector<8x128xf32>
    %67 = arith.mulf %32, %66 : vector<8x128xf32>
    %c0_8 = arith.constant 0 : index
    %c0_9 = arith.constant 0 : index
    %c0_10 = arith.constant 0 : index
    %c0_11 = arith.constant 0 : index
    %68 = vector.load %arg4[%c0_8, %c0_9, %c0_10, %c0_11] : memref<1x3x8x128xf32, #tpu.memory_space<vmem>>, vector<1x1x8x128xf32>
    %69 = vector.shape_cast %68 : vector<1x1x8x128xf32> to vector<8x128xf32>
    %70 = vector.shape_cast %67 : vector<8x128xf32> to vector<1x1x8x128xf32>
    tpu.vector_store %arg4[%c0_8, %c0_9, %c0_10, %c0_11], %70 {strides = array<i32>} : memref<1x3x8x128xf32, #tpu.memory_space<vmem>>, vector<1x1x8x128xf32>,
    %71 = arith.mulf %45, %66 : vector<8x128xf32>
    %c0_12 = arith.constant 0 : index
    %c1_13 = arith.constant 1 : index
    %c0_14 = arith.constant 0 : index
    %c0_15 = arith.constant 0 : index
    %72 = vector.load %arg4[%c0_12, %c1_13, %c0_14, %c0_15] : memref<1x3x8x128xf32, #tpu.memory_space<vmem>>, vector<1x1x8x128xf32>
    %73 = vector.shape_cast %72 : vector<1x1x8x128xf32> to vector<8x128xf32>
    %74 = vector.shape_cast %71 : vector<8x128xf32> to vector<1x1x8x128xf32>
    tpu.vector_store %arg4[%c0_12, %c1_13, %c0_14, %c0_15], %74 {strides = array<i32>} : memref<1x3x8x128xf32, #tpu.memory_space<vmem>>, vector<1x1x8x128xf32>,
    %75 = arith.mulf %58, %66 : vector<8x128xf32>
    %c0_16 = arith.constant 0 : index
    %c2_17 = arith.constant 2 : index
    %c0_18 = arith.constant 0 : index
    %c0_19 = arith.constant 0 : index
    %76 = vector.load %arg4[%c0_16, %c2_17, %c0_18, %c0_19] : memref<1x3x8x128xf32, #tpu.memory_space<vmem>>, vector<1x1x8x128xf32>
    %77 = vector.shape_cast %76 : vector<1x1x8x128xf32> to vector<8x128xf32>
    %78 = vector.shape_cast %75 : vector<8x128xf32> to vector<1x1x8x128xf32>
    tpu.vector_store %arg4[%c0_16, %c2_17, %c0_18, %c0_19], %78 {strides = array<i32>} : memref<1x3x8x128xf32, #tpu.memory_space<vmem>>, vector<1x1x8x128xf32>,
    return
  }
  func.func @transform_0(%arg0: i32, %arg1: i32) -> (i32, i32) {
    %c0_i32 = arith.constant 0 : i32
    %c0_i32_0 = arith.constant 0 : i32
    %c0_i32_1 = arith.constant 0 : i32
    return %c0_i32, %c0_i32_0 : i32, i32
  }
  func.func @transform_1(%arg0: i32, %arg1: i32) -> (i32, i32, i32, i32) {
    %c0_i32 = arith.constant 0 : i32
    %c0_i32_0 = arith.constant 0 : i32
    %c0_i32_1 = arith.constant 0 : i32
    %c0_i32_2 = arith.constant 0 : i32
    return %c0_i32, %c0_i32_0, %arg1, %c0_i32_1 : i32, i32, i32, i32
  }
  func.func @transform_2(%arg0: i32, %arg1: i32) -> (i32, i32, i32, i32) {
    %c0_i32 = arith.constant 0 : i32
    %c0_i32_0 = arith.constant 0 : i32
    %c0_i32_1 = arith.constant 0 : i32
    return %arg0, %c0_i32, %arg1, %c0_i32_0 : i32, i32, i32, i32
  }
}

</mosaic_0001>

<bundles_post_ra>
// kernel: tpu_custom_call.1
= control target key start
LH: loop header
LB: loop body
LE: loop exit
PB: predicated region body
PF: predicated region fallthrough
CT: control target
= control target key end

     0   :  { %7 = vsyncpa [#allocation5], 0  ;;  %s759_s0 = inlined_call_operand.hbm [shape: f32[2,13], index: 0, kind: input, shape index: {}]   ;;  %s760_s1 = inlined_call_operand.hbm [shape: f32[1,2,8,128], index: 1, kind: input, shape index: {}]   ;;  %s761_s2 = inlined_call_operand.hbm [shape: f32[2,3,8,128], index: 2, kind: output, shape index: {}]  }
   0x1   :  { %8 = vsyncpa [#allocation3], 0 }
   0x2   :  { %9 = vsyncpa [#allocation4], 0 }
   0x3   :  { %11 = vsyncpa [#allocation4 + $0x1], 0  ;;  %s587_s9 = smov 0   ;;  %s589_s10 = smov 0  }
   0x4   :  { %s591_s11 = smov 0   ;;  %s593_s12 = smov 0  }
   0x5   :  { %s595_s13 = smov 0   ;;  %s597_s14 = smov 0  }
   0x6 LB: > { %s344_s15 = sadd.s32 4294967295, %s563_s14   ;;  %s345_s16 = sadd.s32 4294967294, %s563_s14   ;;  %s563_s14 = sphi %s597_s14, %s17_s14   ;;  %s559_s13 = sphi %s595_s13, %s771_s13   ;;  %s555_s12 = sphi %s593_s12, %s770_s12   ;;  %s551_s11 = sphi %s591_s11, %s769_s11   ;;  %s547_s10 = sphi %s589_s10, %s768_s10   ;;  %s543_s9 = sphi %s587_s9, %s767_s9  }
   0x7   : > { %s29_s17 = sadd.s32 1, %s559_s13  ;;  %s85_s18 = sadd.s32 1, %s551_s11 }
   0x8   : > { %p31_p0 = scmp.ge.s32.totalorder %s29_s17, 2  ;;  %p95_p1 = scmp.ne.s32.totalorder %s551_s11, %s547_s10 }
   0x9   : > { %p96_p2 = scmp.eq.s32.totalorder %s344_s15, 1  ;;  %p101_p3 = scmp.ne.s32.totalorder %s547_s10, %s543_s9 }
   0xa   : > { %s773_s17 = smov (%p31_p0, %s29_s17), 0  ;;  %p102_p5 = scmp.eq.s32.totalorder %s345_s16, 1 }
   0xb   : > { %p627_p4 = por %p96_p2, %p95_p1  ;;  %s80_s20 = ssub.s32 %s559_s13, %s773_s17 }
   0xc   : > { %p346_p6 = scmp.ge.s32.totalorder %s563_s14, 1  ;;  %p83_p7 = scmp.eq.s32.totalorder %s80_s20, 0 }
   0xd   : > { %p634_p8 = por %p102_p5, %p101_p3  ;;  %p109_p9 = scmp.lt.s32.totalorder %s563_s14, 3 }
   0xe   : > { %s640_s22 = scalar_select %p83_p7, %s551_s11, %s85_s18  }
   0xf   : > { %p642_p10 = pnand %p346_p6, %p109_p9  ;;  %p646_p11 = scmp.eq.s32.totalorder %s344_s15, 0 }
  0x10   : > { %s565_s25 = smov [#allocation6]   ;;  %s566_s28 = smov [#allocation2]  }
  0x11   : > { %p370_p12 = pneg %p642_p10  ;;  %s132_s26 = sshll.u32 %s565_s25, 4  ;;  %s133_s26 = int_to_ptr.vmem [resolvable:$true] %s132_s26 }
  0x12   : > { %s464_s3 = scalar_lea.vmem %s133_s26, 256  ;;  %p472_p5 = scmp.lt.s32.totalorder %s133_s26, %s133_s26 }
  0x13   : > { %p654_p13 = pnand %p646_p11, %p370_p12  ;;  %p465_p1 = scmp.ne.s32.totalorder %s133_s26, %s464_s3 }
  0x14   : > { %p473_p6 = scmp.lt.s32.totalorder %s464_s3, %s464_s3 }
  0x15   : > { %373 = dma.hbm_to_smem (!%p654_p13), %s759_s0, 32, %s566_s28, [#allocation5]  }
  0x16   : > { %p455_p0 = pneg %p654_p13  ;;  %p474_p7 = por %p473_p6, %p472_p5 }
  0x18   : > { %p467_p2 = pnand %p465_p1, %p455_p0 }
  0x1a   : > { %p468_p3 = pneg %p467_p2 }
  0x1c   : > { %p475_p9 = pnand %p474_p7, %p468_p3 }
  0x1e   : > { %478 = shalt.err (!%p475_p9)
}
  0x1f   : > { %s567_s4 = smov 128   ;;  %s568_s5 = smov 8  }
  0x20   : > { %376 = dma.hbm_to_vmem [thread:$0]  (!%p654_p13), %s760_s1, 256, %s133_s26, [#allocation3], %s567_s4, %s567_s4, %s568_s5  }
  0x21   : > { %148 = sbr.rel (%p642_p10) target bundleno = 105 (0x69), region = 28 }
  0x26   : > { %530 = dma.done.wait (%p646_p11), [#allocation5], 32  }
  0x27   : > { %532 = vsyncadd (%p646_p11), [#allocation5], 4294967264 }
  0x28   : > { %534 = dma.done.wait (%p646_p11), [#allocation3], 256  }
  0x29   : > { %536 = vsyncadd (%p646_p11), [#allocation3], 4294967040 }
  0x2a   : > { %158 = sfence }
  0x2b   : > { %s681_s8 = sshll.u32 %s555_s12, 7  ;;  %v178_v0 = vld [vmem:[#allocation6] sm:$0xff]  ;;  %v180_v1 = vld [vmem:[#allocation6 + $0x8] sm:$0xff] }
  0x2c   : > { %s684_s15 = sld [smem:[#allocation2 + %s681_s8]]  ;;  %s172_s16 = sadd.s32 1, %s681_s8 }
  0x2d   : > { %s174_s18 = sadd.s32 2, %s681_s8  ;;  %s688_s20 = sld [smem:[#allocation2 + %s172_s16]] }
  0x2e   : > { %s175_s23 = sld [smem:[#allocation2 + %s174_s18]]  ;;  %s176_s24 = sadd.s32 3, %s681_s8 }
  0x2f   : > { %s177_s25 = sld [smem:[#allocation2 + %s176_s24]]  ;;  %s189_s26 = sadd.s32 4, %s681_s8 }
  0x30   : > { %s190_s27 = sld [smem:[#allocation2 + %s189_s26]]  ;;  %s191_s28 = sadd.s32 5, %s681_s8 }
  0x31   : > { %s192_s29 = sld [smem:[#allocation2 + %s191_s28]]  ;;  %s193_s30 = sadd.s32 6, %s681_s8 }
  0x32   : > { %s694_s3 = sld [smem:[#allocation2 + %s193_s30]]  ;;  %s202_s4 = sadd.s32 7, %s681_s8  ;;  %v183_v3 = vstv %s684_s15 }
  0x33   : > { %s203_s5 = sld [smem:[#allocation2 + %s202_s4]]  ;;  %s204_s6 = sadd.s32 8, %s681_s8  ;;  %v187_v6 = vstv %s688_s20 }
  0x34   : > { %v181_v2 = vstv %s175_s23  ;;  %s205_s7 = sld [smem:[#allocation2 + %s204_s6]]  ;;  %s206_s16 = sadd.s32 9, %s681_s8 }
  0x35   : > { %v182_v4 = vsub.f32 %v178_v0, %v181_v2  ;;  %v185_v5 = vstv %s177_s25  ;;  %s207_s18 = sld [smem:[#allocation2 + %s206_s16]]  ;;  %s215_s24 = sadd.s32 10, %s681_s8 }
  0x36   : > { %v186_v7 = vsub.f32 %v180_v1, %v185_v5  ;;  %v195_v8 = vstv %s190_s27  ;;  %s216_s26 = sld [smem:[#allocation2 + %s215_s24]]  ;;  %s217_s28 = sadd.s32 11, %s681_s8 }
  0x37   : > { %v184_v9 = vmul.f32 %v183_v3, %v182_v4  ;;  %v197_v10 = vstv %s192_s29  ;;  %s218_s30 = sld [smem:[#allocation2 + %s217_s28]]  ;;  %s219_s4 = sadd.s32 12, %s681_s8 }
  0x38   : > { %v188_v11 = vmul.f32 %v187_v6, %v186_v7  ;;  %s220_s23 = sld [smem:[#allocation2 + %s219_s4]]  ;;  %v200_v17 = vstv %s694_s3  ;;  %s167_s8 = sand.u32 1, %s547_s10  }
  0x39   : > { %v196_v12 = vmul.f32 %v195_v8, %v184_v9  ;;  %v208_v13 = vstv %s203_s5  ;;  %s358_s15 = smul.u32 24, %s167_s8  ;;  %s714_s6 = scalar_lea.sflag [#allocation4], %s167_s8 }
  0x3a   : > { %v198_v14 = vmul.f32 %v197_v10, %v188_v11  ;;  %v209_v15 = vmul.f32 %v208_v13, %v184_v9  ;;  %v210_v16 = vstv %s205_s7  ;;  %s359_s27 = smul.u32 384, %s555_s12  ;;  %s569_s7 = smov [#allocation7]  }
  0x3b   : > { %v211_v18 = vmul.f32 %v210_v16, %v188_v11  ;;  %v213_v20 = vstv %s207_s18  ;;  %s169_s20 = scalar_lea.vmem [#allocation7], %s358_s15  ;;  %s483_s16 = sshll.u32 %s569_s7, 4  ;;  %s484_s16 = int_to_ptr.vmem [resolvable:$false] %s483_s16 }
  0x3c   : > { %v199_v19 = vadd.f32 %v198_v14, %v196_v12  ;;  %v221_v21 = vstv %s216_s26  ;;  %s258_s25 = sshll.u32 %s169_s20, 4  ;;  %s712_s5 = scalar_lea.hbm %s761_s2, %s359_s27  ;;  %s707_s25 = int_to_ptr.vmem [resolvable:$true] %s258_s25 }
  0x3d   : > { %v212_v22 = vadd.f32 %v211_v18, %v209_v15  ;;  %v222_v23 = vmul.f32 %v221_v21, %v184_v9  ;;  %v223_v24 = vstv %s218_s30  ;;  %s479_s12 = scalar_lea.vmem %s707_s25, 384  ;;  %s485_s18 = scalar_lea.vmem %s484_s16, 768 }
  0x3e   : > { %v201_v25 = vadd.f32 %v200_v17, %v199_v19  ;;  %v224_v26 = vmul.f32 %v223_v24, %v188_v11  ;;  %v226_v28 = vstv %s220_s23  ;;  %p480_p10 = scmp.ne.s32.totalorder %s707_s25, %s479_s12  ;;  %p486_p13 = scmp.lt.s32.totalorder %s707_s25, %s484_s16 }
  0x3f   : > { %v214_v27 = vadd.f32 %v213_v20, %v212_v22  ;;  %p487_p0 = scmp.lt.s32.totalorder %s485_s18, %s479_s12 }
  0x40   : > { %v225_v29 = vadd.f32 %v224_v26, %v222_v23  ;;  %v228_v30 = vmul.f32 %v201_v25, %v201_v25  ;;  %p481_p11 = pnand %p480_p10, %p627_p4 }
  0x41   : > { %v229_v31 = vmul.f32 %v214_v27, %v214_v27  ;;  %p488_p1 = por %p487_p0, %p486_p13 }
  0x42   : > { %v227_v32 = vadd.f32 %v226_v28, %v225_v29  ;;  %p482_p12 = pneg %p481_p11 }
  0x43   : > { %v230_v33 = vadd.f32 %v229_v31, %v228_v30 }
  0x44   : > { %v231_v34 = vmul.f32 %v227_v32, %v227_v32  ;;  %p489_p2 = pnand %p488_p1, %p482_p12 }
  0x46   : > { %v232_v35 = vadd.f32 %v231_v34, %v230_v33 }
  0x48   : > { %v233_v36 = vmax.f32 %v232_v35, 1e-24 }
  0x4a   : > { %440 = vrsqrt.f32 %v233_v36 }
  0x57   : > { %v441_v37 = vpop.eup %440 }
  0x58   : > { %v235_v38 = vmul.f32 %v441_v37, %v201_v25  ;;  %v237_v39 = vmul.f32 %v441_v37, %v214_v27  ;;  %v240_v40 = vmul.f32 %v441_v37, %v227_v32 }
  0x5a   : > { %236 = vst [vmem:[%s169_s20] sm:$0xff] %v235_v38  ;;  %353 = vst [vmem:[%s169_s20 + $0x8] sm:$0xff] %v237_v39 }
  0x5b   : > { %354 = vst [vmem:[%s169_s20 + $0x10] sm:$0xff] %v240_v40 }
  0x5c   : > { %492 = shalt.err (!%p489_p2)
}
  0x5d   : > { %s493_s24 = scalar_lea.hbm %s712_s5, 384  ;;  %s497_s30 = scalar_lea.hbm %s761_s2, 768 }
  0x5e   : > { %p494_p3 = scmp.ne.s32.totalorder %s712_s5, %s493_s24  ;;  %p498_p7 = scmp.lt.s32.totalorder %s712_s5, %s761_s2 }
  0x5f   : > { %p499_p9 = scmp.lt.s32.totalorder %s497_s30, %s493_s24 }
  0x60   : > { %p495_p5 = pnand %p494_p3, %p627_p4 }
  0x61   : > { %p500_p10 = por %p499_p9, %p498_p7 }
  0x62   : > { %p496_p6 = pneg %p495_p5 }
  0x64   : > { %p501_p11 = pnand %p500_p10, %p496_p6 }
  0x66   : > { %504 = shalt.err (!%p501_p11)
}
  0x67   : > { %s570_s8 = smov 128   ;;  %s571_s15 = smov 8  }
  0x68   : > { %368 = dma.vmem_to_hbm [thread:$0]  (%p627_p4), %s707_s25, 384, %s712_s5, %s714_s6, %s570_s8, %s570_s8, %s571_s15  }
  0x69 PF: > { %p385_p12 = scmp.ge.s32.totalorder %s563_s14, 2  ;;  %s273_s20 = sand.u32 1, %s543_s9  }
  0x6a   : > { %s274_s27 = scalar_lea.sflag [#allocation4], %s273_s20 }
  0x6b   : > { %p378_p13 = pnand %p385_p12, %p634_p8 }
  0x6d   : > { %p379_p0 = pneg %p378_p13 }
  0x6f   : > { %538 = dma.done.wait (%p379_p0), %s274_s27, 384  }
  0x70   : > { %540 = vsyncadd (%p379_p0), %s274_s27, 4294966912  ;;  %s17_s14 = sadd.s32 1, %s563_s14   ;;  %s767_s9 = smov %s547_s10 }
  0x71   : > { %p14_p1 = scmp.ge.s32.totalorder %s17_s14, 4   ;;  %s768_s10 = smov %s551_s11 }
  0x72   : > { %s769_s11 = smov %s640_s22  ;;  %s770_s12 = smov %s559_s13 }
  0x73   : > { %s771_s13 = smov %s773_s17  ;;  %16 = sbr.rel (!%p14_p1) target bundleno = 6 (0x6), region = 74 }
  0x78   :  { %279 = vsyncpa [#allocation3], 1 }
  0x79   :  { %281 = vsyncpa [#allocation3 + $0x1], 1 }
  0x7a   :  { %282 = vsyncpa [#allocation4], 1 }
  0x7b   :  { %284 = vsyncpa [#allocation4 + $0x1], 1 }
  0x7c   :  { %285 = vsyncpa [#allocation5], 1 }
  0x7d   :  { %287 = vsyncpa [#allocation5 + $0x1], 1 }

</bundles_post_ra>
